<compile_context>
chip_gen: v6e
topology: v6e:2x2x1
jax: 0.10.0
libtpu: 0.0.40
codegen_flags: <defaults>
</compile_context>

<pallas_src>
import functools

import jax
import jax.numpy as jnp
from jax import lax
from jax.experimental import pallas as pl
from jax.experimental.pallas import tpu as pltpu

TAU = 0.2


def _elu(x):
    # PyTorch nn.ELU(alpha=1.0): x if x > 0 else exp(x) - 1  (keep in f32: EUP path)
    return jnp.where(x > 0, x, jnp.exp(jnp.minimum(x, 0.0)) - 1.0)


def _sim_loss(z1, z2, inv_tau):
    """log(sum(exp(cos/tau))) - log(sum(exp(diag_cos/tau)))  ==  -log(pos/all)."""
    z1h = z1 * lax.rsqrt(jnp.sum(z1 * z1, axis=-1, keepdims=True))
    z2h = z2 * lax.rsqrt(jnp.sum(z2 * z2, axis=-1, keepdims=True))
    # cos[i,j] = <z1h[i], z2h[j]>   -- contraction on axis 1 of both (no z2.T on XLU)
    cos = lax.dot_general(z1h, z2h, (((1,), (1,)), ((), ())),
                          preferred_element_type=jnp.float32)           # (N, N)
    all_sum = jnp.sum(jnp.exp(cos * inv_tau))
    # diagonal cosines directly: O(N*H) VALU work, N exp ops, no iota mask.
    diag = jnp.sum(z1h * z2h, axis=-1, keepdims=True)                    # (N, 1)
    pos_sum = jnp.sum(jnp.exp(diag * inv_tau))
    return jnp.log(all_sum) - jnp.log(pos_sum)


def _contrast_kernel(v12_ref, w_ref, b_ref, out_ref, *, n, inv_tau):
    v12 = v12_ref[...].astype(jnp.float32)   # (2N, H)  rows 0..N-1 = v1, N..2N-1 = v2
    w = w_ref[...].astype(jnp.float32)       # (H, H)   PyTorch layout (out, in)
    b = b_ref[...].astype(jnp.float32)       # (1, H)

    # Fused projection head for both views: y = x @ W.T + b, ELU.
    # trans_b handled by the MXU via the (1,1) contraction -- no materialized w.T.
    p12 = _elu(lax.dot_general(v12, w, (((1,), (1,)), ((), ())),
                               preferred_element_type=jnp.float32) + b)

    v1, v2 = v12[:n], v12[n:]
    p1, p2 = p12[:n], p12[n:]

    # sim(p2,p1) is the elementwise transpose of sim(p1,p2), so the two cross
    # losses are mathematically identical -> compute once, double.
    loss = (2.0 * _sim_loss(p1, p2, inv_tau)      # loss_1to2 + loss_2to1
            + _sim_loss(v1, v1, inv_tau)          # loss_1to1 (raw embeddings, per ref)
            + _sim_loss(v2, v2, inv_tau))         # loss_2to2
    out_ref[0, 0] = loss


@functools.partial(jax.jit, static_argnames=("tau",))
def model_contrast_loss(v1_embs, v2_embs, weight, bias, tau=TAU):
    """v1_embs, v2_embs: (N, H). weight: (H, H) torch-style (out, in). bias: (H,)."""
    n, h = v1_embs.shape
    v12 = jnp.concatenate([v1_embs, v2_embs], axis=0)   # (2N, H): one MXU push for proj
    bias2d = bias.reshape(1, h)

    kernel = functools.partial(_contrast_kernel, n=n, inv_tau=1.0 / tau)
    vmem_spec = pl.BlockSpec(memory_space=pltpu.MemorySpace.VMEM)

    out = pl.pallas_call(
        kernel,
        out_shape=jax.ShapeDtypeStruct((1, 1), jnp.float32),
        in_specs=[vmem_spec, vmem_spec, vmem_spec],
        out_specs=pl.BlockSpec(memory_space=pltpu.MemorySpace.SMEM),
    )(v12, weight, bias2d)
    return out[0, 0]


def _reference_loss(v1, v2, w, b, tau=TAU):
    # Pure-JAX reference mirroring the PyTorch forward, for sanity checking.
    def proj(x):
        return jax.nn.elu(x @ w.T + b)

    def sim(z1, z2):
        n1 = jnp.linalg.norm(z1, axis=-1, keepdims=True)
        n2 = jnp.linalg.norm(z2, axis=-1, keepdims=True)
        return jnp.exp((z1 @ z2.T) / (n1 @ n2.T) / tau)

    def loss(s):
        pos = jnp.eye(s.shape[0], dtype=s.dtype)
        return -jnp.log(jnp.sum(s * pos) / jnp.sum(s))

    p1, p2 = proj(v1), proj(v2)
    return (loss(sim(p1, p2)) + loss(sim(p2, p1))
            + loss(sim(v1, v1)) + loss(sim(v2, v2)))


if __name__ == "__main__":
    N, H = 8, 32  # small shapes: batch of 8 embeddings, hidden_dim = 32

    key = jax.random.PRNGKey(0)
    k1, k2, kw, kb = jax.random.split(key, 4)

    v1 = jax.random.normal(k1, (N, H), dtype=jnp.float32)
    v2 = jax.random.normal(k2, (N, H), dtype=jnp.float32)

    # nn.init.xavier_normal_(weight, gain=1.414): std = gain * sqrt(2 / (fan_in + fan_out))
    gain = 1.414
    std = gain * (2.0 / (H + H)) ** 0.5
    weight = std * jax.random.normal(kw, (H, H), dtype=jnp.float32)
    # nn.Linear default bias init: U(-1/sqrt(fan_in), 1/sqrt(fan_in))
    bound = 1.0 / (H ** 0.5)
    bias = jax.random.uniform(kb, (H,), minval=-bound, maxval=bound, dtype=jnp.float32)

    loss = model_contrast_loss(v1, v2, weight, bias)
    jax.block_until_ready(loss)

    ref = _reference_loss(v1, v2, weight, bias)
    assert jnp.allclose(loss, ref, rtol=1e-5, atol=1e-5), (loss, ref)

    print("KERNEL_OK")
</pallas_src>

<mosaic_0001>
module attributes {stable_mosaic.version = 11 : i64} {
  func.func @_contrast_kernel(%arg0: memref<16x32xf32, #tpu.memory_space<vmem>>, %arg1: memref<32x32xf32, #tpu.memory_space<vmem>>, %arg2: memref<1x32xf32, #tpu.memory_space<vmem>>, %arg3: memref<1x1xf32, #tpu.memory_space<smem>>) attributes {dimension_semantics = [], scalar_prefetch = 0 : i64, scratch_operands = 0 : i64, tpu.core_type = #tpu.core_type<tc>} {
    %c0 = arith.constant 0 : index
    %c0_0 = arith.constant 0 : index
    %0 = vector.load %arg0[%c0, %c0_0] : memref<16x32xf32, #tpu.memory_space<vmem>>, vector<16x32xf32>
    %c0_1 = arith.constant 0 : index
    %c0_2 = arith.constant 0 : index
    %1 = vector.load %arg1[%c0_1, %c0_2] : memref<32x32xf32, #tpu.memory_space<vmem>>, vector<32x32xf32>
    %c0_3 = arith.constant 0 : index
    %c0_4 = arith.constant 0 : index
    %2 = vector.load %arg2[%c0_3, %c0_4] : memref<1x32xf32, #tpu.memory_space<vmem>>, vector<1x32xf32>
    %cst = arith.constant dense<0.000000e+00> : vector<16x32xf32>
    %3 = tpu.matmul %0, %1, %cst {dimension_numbers = #tpu.dot_dimension_numbers<[1], [1], [0], [0], [0, 0, 1, 0], [], []>} : vector<16x32xf32>, vector<32x32xf32>, vector<16x32xf32> -> vector<16x32xf32>
    %4 = vector.broadcast %2 : vector<1x32xf32> to vector<16x32xf32>
    %5 = arith.addf %3, %4 : vector<16x32xf32>
    %cst_5 = arith.constant 0.000000e+00 : f32
    %6 = vector.broadcast %cst_5 : f32 to vector<16x32xf32>
    %7 = arith.cmpf ogt, %5, %6 : vector<16x32xf32>
    %cst_6 = arith.constant 0.000000e+00 : f32
    %8 = vector.broadcast %cst_6 : f32 to vector<16x32xf32>
    %9 = arith.minimumf %5, %8 : vector<16x32xf32>
    %10 = math.exp %9 : vector<16x32xf32>
    %cst_7 = arith.constant 1.000000e+00 : f32
    %11 = vector.broadcast %cst_7 : f32 to vector<16x32xf32>
    %12 = arith.subf %10, %11 : vector<16x32xf32>
    %13 = arith.select %7, %5, %12 : vector<16x32xi1>, vector<16x32xf32>
    %14 = vector.extract_strided_slice %0 {offsets = [0, 0], sizes = [8, 32], strides = [1, 1]} : vector<16x32xf32> to vector<8x32xf32>
    %15 = vector.extract_strided_slice %0 {offsets = [8, 0], sizes = [8, 32], strides = [1, 1]} : vector<16x32xf32> to vector<8x32xf32>
    %16 = vector.extract_strided_slice %13 {offsets = [0, 0], sizes = [8, 32], strides = [1, 1]} : vector<16x32xf32> to vector<8x32xf32>
    %17 = vector.extract_strided_slice %13 {offsets = [8, 0], sizes = [8, 32], strides = [1, 1]} : vector<16x32xf32> to vector<8x32xf32>
    %18 = arith.mulf %16, %16 : vector<8x32xf32>
    %cst_8 = arith.constant dense<0.000000e+00> : vector<8xf32>
    %19 = vector.multi_reduction <add>, %18, %cst_8 [1] : vector<8x32xf32> to vector<8xf32>
    %20 = vector.shape_cast %19 : vector<8xf32> to vector<8x1xf32>
    %21 = math.rsqrt %20 : vector<8x1xf32>
    %22 = vector.broadcast %21 : vector<8x1xf32> to vector<8x32xf32>
    %23 = arith.mulf %16, %22 : vector<8x32xf32>
    %24 = arith.mulf %17, %17 : vector<8x32xf32>
    %cst_9 = arith.constant dense<0.000000e+00> : vector<8xf32>
    %25 = vector.multi_reduction <add>, %24, %cst_9 [1] : vector<8x32xf32> to vector<8xf32>
    %26 = vector.shape_cast %25 : vector<8xf32> to vector<8x1xf32>
    %27 = math.rsqrt %26 : vector<8x1xf32>
    %28 = vector.broadcast %27 : vector<8x1xf32> to vector<8x32xf32>
    %29 = arith.mulf %17, %28 : vector<8x32xf32>
    %cst_10 = arith.constant dense<0.000000e+00> : vector<8x8xf32>
    %30 = tpu.matmul %23, %29, %cst_10 {dimension_numbers = #tpu.dot_dimension_numbers<[1], [1], [0], [0], [0, 0, 1, 0], [], []>} : vector<8x32xf32>, vector<8x32xf32>, vector<8x8xf32> -> vector<8x8xf32>
    %cst_11 = arith.constant 5.000000e+00 : f32
    %31 = vector.broadcast %cst_11 : f32 to vector<8x8xf32>
    %32 = arith.mulf %30, %31 : vector<8x8xf32>
    %33 = math.exp %32 : vector<8x8xf32>
    %34 = vector.shape_cast %33 : vector<8x8xf32> to vector<1x8x8xf32>
    %cst_12 = arith.constant dense<0.000000e+00> : vector<1xf32>
    %35 = vector.multi_reduction <add>, %34, %cst_12 [1, 2] : vector<1x8x8xf32> to vector<1xf32>
    %36 = vector.shape_cast %35 : vector<1xf32> to vector<1x1x1xf32>
    %37 = vector.extract %36[0, 0, 0] : f32 from vector<1x1x1xf32>
    %38 = arith.mulf %23, %29 : vector<8x32xf32>
    %cst_13 = arith.constant dense<0.000000e+00> : vector<8xf32>
    %39 = vector.multi_reduction <add>, %38, %cst_13 [1] : vector<8x32xf32> to vector<8xf32>
    %40 = vector.shape_cast %39 : vector<8xf32> to vector<8x1xf32>
    %cst_14 = arith.constant 5.000000e+00 : f32
    %41 = vector.broadcast %cst_14 : f32 to vector<8x1xf32>
    %42 = arith.mulf %40, %41 : vector<8x1xf32>
    %43 = math.exp %42 : vector<8x1xf32>
    %44 = vector.shape_cast %43 : vector<8x1xf32> to vector<1x8x1xf32>
    %cst_15 = arith.constant dense<0.000000e+00> : vector<1xf32>
    %45 = vector.multi_reduction <add>, %44, %cst_15 [1, 2] : vector<1x8x1xf32> to vector<1xf32>
    %46 = vector.shape_cast %45 : vector<1xf32> to vector<1x1x1xf32>
    %47 = vector.extract %46[0, 0, 0] : f32 from vector<1x1x1xf32>
    %48 = math.log %37 : f32
    %49 = math.log %47 : f32
    %50 = arith.subf %48, %49 : f32
    %cst_16 = arith.constant 2.000000e+00 : f32
    %51 = arith.mulf %cst_16, %50 : f32
    %52 = arith.mulf %14, %14 : vector<8x32xf32>
    %cst_17 = arith.constant dense<0.000000e+00> : vector<8xf32>
    %53 = vector.multi_reduction <add>, %52, %cst_17 [1] : vector<8x32xf32> to vector<8xf32>
    %54 = vector.shape_cast %53 : vector<8xf32> to vector<8x1xf32>
    %55 = math.rsqrt %54 : vector<8x1xf32>
    %56 = vector.broadcast %55 : vector<8x1xf32> to vector<8x32xf32>
    %57 = arith.mulf %14, %56 : vector<8x32xf32>
    %58 = arith.mulf %14, %14 : vector<8x32xf32>
    %cst_18 = arith.constant dense<0.000000e+00> : vector<8xf32>
    %59 = vector.multi_reduction <add>, %58, %cst_18 [1] : vector<8x32xf32> to vector<8xf32>
    %60 = vector.shape_cast %59 : vector<8xf32> to vector<8x1xf32>
    %61 = math.rsqrt %60 : vector<8x1xf32>
    %62 = vector.broadcast %61 : vector<8x1xf32> to vector<8x32xf32>
    %63 = arith.mulf %14, %62 : vector<8x32xf32>
    %cst_19 = arith.constant dense<0.000000e+00> : vector<8x8xf32>
    %64 = tpu.matmul %57, %63, %cst_19 {dimension_numbers = #tpu.dot_dimension_numbers<[1], [1], [0], [0], [0, 0, 1, 0], [], []>} : vector<8x32xf32>, vector<8x32xf32>, vector<8x8xf32> -> vector<8x8xf32>
    %cst_20 = arith.constant 5.000000e+00 : f32
    %65 = vector.broadcast %cst_20 : f32 to vector<8x8xf32>
    %66 = arith.mulf %64, %65 : vector<8x8xf32>
    %67 = math.exp %66 : vector<8x8xf32>
    %68 = vector.shape_cast %67 : vector<8x8xf32> to vector<1x8x8xf32>
    %cst_21 = arith.constant dense<0.000000e+00> : vector<1xf32>
    %69 = vector.multi_reduction <add>, %68, %cst_21 [1, 2] : vector<1x8x8xf32> to vector<1xf32>
    %70 = vector.shape_cast %69 : vector<1xf32> to vector<1x1x1xf32>
    %71 = vector.extract %70[0, 0, 0] : f32 from vector<1x1x1xf32>
    %72 = arith.mulf %57, %63 : vector<8x32xf32>
    %cst_22 = arith.constant dense<0.000000e+00> : vector<8xf32>
    %73 = vector.multi_reduction <add>, %72, %cst_22 [1] : vector<8x32xf32> to vector<8xf32>
    %74 = vector.shape_cast %73 : vector<8xf32> to vector<8x1xf32>
    %cst_23 = arith.constant 5.000000e+00 : f32
    %75 = vector.broadcast %cst_23 : f32 to vector<8x1xf32>
    %76 = arith.mulf %74, %75 : vector<8x1xf32>
    %77 = math.exp %76 : vector<8x1xf32>
    %78 = vector.shape_cast %77 : vector<8x1xf32> to vector<1x8x1xf32>
    %cst_24 = arith.constant dense<0.000000e+00> : vector<1xf32>
    %79 = vector.multi_reduction <add>, %78, %cst_24 [1, 2] : vector<1x8x1xf32> to vector<1xf32>
    %80 = vector.shape_cast %79 : vector<1xf32> to vector<1x1x1xf32>
    %81 = vector.extract %80[0, 0, 0] : f32 from vector<1x1x1xf32>
    %82 = math.log %71 : f32
    %83 = math.log %81 : f32
    %84 = arith.subf %82, %83 : f32
    %85 = arith.addf %51, %84 : f32
    %86 = arith.mulf %15, %15 : vector<8x32xf32>
    %cst_25 = arith.constant dense<0.000000e+00> : vector<8xf32>
    %87 = vector.multi_reduction <add>, %86, %cst_25 [1] : vector<8x32xf32> to vector<8xf32>
    %88 = vector.shape_cast %87 : vector<8xf32> to vector<8x1xf32>
    %89 = math.rsqrt %88 : vector<8x1xf32>
    %90 = vector.broadcast %89 : vector<8x1xf32> to vector<8x32xf32>
    %91 = arith.mulf %15, %90 : vector<8x32xf32>
    %92 = arith.mulf %15, %15 : vector<8x32xf32>
    %cst_26 = arith.constant dense<0.000000e+00> : vector<8xf32>
    %93 = vector.multi_reduction <add>, %92, %cst_26 [1] : vector<8x32xf32> to vector<8xf32>
    %94 = vector.shape_cast %93 : vector<8xf32> to vector<8x1xf32>
    %95 = math.rsqrt %94 : vector<8x1xf32>
    %96 = vector.broadcast %95 : vector<8x1xf32> to vector<8x32xf32>
    %97 = arith.mulf %15, %96 : vector<8x32xf32>
    %cst_27 = arith.constant dense<0.000000e+00> : vector<8x8xf32>
    %98 = tpu.matmul %91, %97, %cst_27 {dimension_numbers = #tpu.dot_dimension_numbers<[1], [1], [0], [0], [0, 0, 1, 0], [], []>} : vector<8x32xf32>, vector<8x32xf32>, vector<8x8xf32> -> vector<8x8xf32>
    %cst_28 = arith.constant 5.000000e+00 : f32
    %99 = vector.broadcast %cst_28 : f32 to vector<8x8xf32>
    %100 = arith.mulf %98, %99 : vector<8x8xf32>
    %101 = math.exp %100 : vector<8x8xf32>
    %102 = vector.shape_cast %101 : vector<8x8xf32> to vector<1x8x8xf32>
    %cst_29 = arith.constant dense<0.000000e+00> : vector<1xf32>
    %103 = vector.multi_reduction <add>, %102, %cst_29 [1, 2] : vector<1x8x8xf32> to vector<1xf32>
    %104 = vector.shape_cast %103 : vector<1xf32> to vector<1x1x1xf32>
    %105 = vector.extract %104[0, 0, 0] : f32 from vector<1x1x1xf32>
    %106 = arith.mulf %91, %97 : vector<8x32xf32>
    %cst_30 = arith.constant dense<0.000000e+00> : vector<8xf32>
    %107 = vector.multi_reduction <add>, %106, %cst_30 [1] : vector<8x32xf32> to vector<8xf32>
    %108 = vector.shape_cast %107 : vector<8xf32> to vector<8x1xf32>
    %cst_31 = arith.constant 5.000000e+00 : f32
    %109 = vector.broadcast %cst_31 : f32 to vector<8x1xf32>
    %110 = arith.mulf %108, %109 : vector<8x1xf32>
    %111 = math.exp %110 : vector<8x1xf32>
    %112 = vector.shape_cast %111 : vector<8x1xf32> to vector<1x8x1xf32>
    %cst_32 = arith.constant dense<0.000000e+00> : vector<1xf32>
    %113 = vector.multi_reduction <add>, %112, %cst_32 [1, 2] : vector<1x8x1xf32> to vector<1xf32>
    %114 = vector.shape_cast %113 : vector<1xf32> to vector<1x1x1xf32>
    %115 = vector.extract %114[0, 0, 0] : f32 from vector<1x1x1xf32>
    %116 = math.log %105 : f32
    %117 = math.log %115 : f32
    %118 = arith.subf %116, %117 : f32
    %119 = arith.addf %85, %118 : f32
    %c0_33 = arith.constant 0 : index
    %c0_34 = arith.constant 0 : index
    %120 = memref.load %arg3[%c0_33, %c0_34] : memref<1x1xf32, #tpu.memory_space<smem>>
    memref.store %119, %arg3[%c0_33, %c0_34] : memref<1x1xf32, #tpu.memory_space<smem>>
    return
  }
}

</mosaic_0001>

<bundles_post_ra>
// kernel: model_contrast_loss.1
= control target key start
LH: loop header
LB: loop body
LE: loop exit
PB: predicated region body
PF: predicated region fallthrough
CT: control target
= control target key end

     0   :  { %vm28_vm0 = vcmask 261120   ;;  %s734_s0 = inlined_call_operand.vmem [shape: f32[16,32], index: 0, kind: input, shape index: {}]   ;;  %s735_s1 = inlined_call_operand.vmem [shape: f32[32,32], index: 1, kind: input, shape index: {}]   ;;  %s736_s2 = inlined_call_operand.vmem [shape: f32[1,32], index: 2, kind: input, shape index: {}]   ;;  %s737_s3 = inlined_call_operand.hbm [shape: f32[1,1], index: 3, kind: output, shape index: {}]  }
   0x1   :  { %v20_v0 = vld [vmem:[%s735_s1 + $0x18] sm:$0xff]  ;;  %v19_v1 = vld [vmem:[%s735_s1 + $0x10] sm:$0xff]  ;;  %v15_v2 = vld [vmem:[%s734_s0] sm:$0xff] }
   0x2   :  { %544 = vmatprep.subr.msk.mxu0 %vm28_vm0, %v20_v0  ;;  %552 = vmatprep.mubr.msk.f32.mxu0 %vm28_vm0, %v15_v2 }
   0x3   :  { %545 = vmatpush3.xpose.msk.msra.mxu0 %vm28_vm0, %v20_v0 }
   0x4   :  { %8 = vsyncpa [#allocation3], 0  ;;  %546 = vmatprep.subr.msk.mxu0 %vm28_vm0, %v19_v1  ;;  %v18_v3 = vld [vmem:[%s735_s1 + $0x8] sm:$0xff]  ;;  %v17_v4 = vld [vmem:[%s735_s1] sm:$0xff]  ;;  %v264_v6 = vmul.f32 %v15_v2, %v15_v2  ;;  %v643_v28 = vmov 0.0   ;;  %vm644_vm3 = vmmov 0  }
   0x5   :  { %v693_v5 = vld [vmem:[%s734_s0 + $0x8] sm:$0xff]  ;;  %v517_v8 = vld [vmem:[%s736_s2] ss:$0 sm:$0xff]  ;;  %555 = vmatprep.subr.mxu1 %v643_v28  ;;  %557 = vmatprep.mubr.msk.f32.mxu1 %vm644_vm3, %v643_v28  ;;  %vm243_vm4 = vcmask 7168   ;;  %vm225_vm5 = vcmask 64512   ;;  %s645_s14 = smov [#allocation2]  }
   0x6   :  { %v265_v7 = vsel %vm28_vm0, %v264_v6, 0.0  ;;  %v383_v27 = vmul.f32 %v693_v5, %v693_v5 }
   0x7   :  { %547 = vmatpush3.xpose.msk.msra.mxu0 %vm28_vm0, %v19_v1  ;;  %266 = vadd.xlane.f32.xlu1 %v265_v7 }
   0x8   :  { %548 = vmatprep.subr.msk.mxu0 %vm28_vm0, %v18_v3  ;;  %v384_v29 = vsel %vm28_vm0, %v383_v27, 0.0 }
   0xb   :  { %549 = vmatpush3.xpose.msk.msra.mxu0 %vm28_vm0, %v18_v3  ;;  %385 = vadd.xlane.f32.xlu1 %v384_v29 }
   0xc   :  { %550 = vmatprep.subr.msk.mxu0 %vm28_vm0, %v17_v4 }
   0xf   :  { %551 = vmatpush3.xpose.msk.msra.mxu0 %vm28_vm0, %v17_v4 }
  0x12   :  { %553 = vmatmul.mubr.msk.f32.vlgmr.msra.gmra.mxu0 %vm28_vm0, %v693_v5 }
  0x90   :  { %v267_v30 = vpop.xlane.xlu1 %266 }
  0x94   :  { %v386_v41 = vpop.xlane.xlu1 %385 }
  0xd2   :  { %v554_v9 = vpop.f32.mrf.mxu0 }
  0xd3   :  { %v119_v10 = vadd.f32 %v554_v9, %v517_v8 }
  0xd4   :  { %v113_v11 = vpop.f32.mrf.mxu0 }
  0xd5   :  { %v125_v12 = vmin.f32 %v119_v10, 0.0  ;;  %v114_v13 = vadd.f32 %v517_v8, %v113_v11  ;;  %vm123_vm1 = vcmp.gt.f32.partialorder %v119_v10, 0.0 }
  0xd7   :  { %v128_v14 = vmul.f32 1.442695, %v125_v12  ;;  %v124_v15 = vmin.f32 %v114_v13, 0.0  ;;  %vm122_vm2 = vcmp.gt.f32.partialorder %v114_v13, 0.0 }
  0xd9   :  { %597 = vpow2.f32 %v128_v14  ;;  %v126_v16 = vmul.f32 1.442695, %v124_v15 }
  0xdb   :  { %599 = vpow2.f32 %v126_v16 }
  0xdc   :  { %601 = vrsqrt.f32 %v267_v30 }
  0xe6   :  { %v598_v17 = vpop.eup %597 }
  0xe7   :  { %v525_v18 = vadd.f32 -1.0, %v598_v17 }
  0xe8   :  { %v600_v19 = vpop.eup %599 }
  0xe9   :  { %v133_v20 = vsel %vm123_vm1, %v119_v10, %v525_v18  ;;  %v524_v21 = vadd.f32 -1.0, %v600_v19  ;;  %v602_v31 = vpop.eup %601 }
  0xea   :  { %v140_v22 = vmul.f32 %v133_v20, %v133_v20  ;;  %v269_v32 = vmul.f32 %v602_v31, %v15_v2 }
  0xeb   :  { %v132_v23 = vsel %vm122_vm2, %v114_v13, %v524_v21 }
  0xec   :  { %v141_v24 = vsel %vm28_vm0, %v140_v22, 0.0  ;;  %v134_v25 = vmul.f32 %v132_v23, %v132_v23  ;;  %v356_v33 = vmul.f32 %v269_v32, %v269_v32 }
  0xed   :  { %142 = vadd.xlane.f32.xlu0 %v141_v24 }
  0xee   :  { %v135_v26 = vsel %vm28_vm0, %v134_v25, 0.0  ;;  %v357_v34 = vsel %vm28_vm0, %v356_v33, 0.0 }
  0xef   :  { %358 = vadd.xlane.f32.xlu1 %v357_v34 }
  0xf1   :  { %136 = vadd.xlane.f32.xlu0 %v135_v26 }
 0x176   :  { %v143_v35 = vpop.xlane.xlu0 %142 }
 0x177   :  { %603 = vrsqrt.f32 %v143_v35 }
 0x178   :  { %v359_v51 = vpop.xlane.xlu1 %358 }
 0x179   :  { %v360_v53 = vmul.f32 5.0, %v359_v51 }
 0x17a   :  { %v137_v36 = vpop.xlane.xlu0 %136 }
 0x17b   :  { %605 = vrsqrt.f32 %v137_v36  ;;  %v361_v57 = vmul.f32 1.442695, %v360_v53 }
 0x17c   :  { %607 = vrsqrt.f32 %v386_v41 }
 0x184   :  { %v604_v37 = vpop.eup %603 }
 0x185   :  { %v145_v38 = vmul.f32 %v604_v37, %v133_v20 }
 0x187   :  { %556 = vmatpush3.xpose.msk.msra.mxu1 %vm28_vm0, %v145_v38 }
 0x188   :  { %v606_v39 = vpop.eup %605  ;;  %560 = vmatprep.subr.mxu1 %v643_v28 }
 0x189   :  { %v139_v40 = vmul.f32 %v606_v39, %v132_v23  ;;  %v608_v44 = vpop.eup %607 }
 0x18a   :  { %v388_v45 = vmul.f32 %v608_v44, %v693_v5 }
 0x18b   :  { %558 = vmatmul.mubr.msk.f32.vlgmr.msra.gmra.mxu1 %vm28_vm0, %v139_v40  ;;  %v236_v42 = vmul.f32 %v145_v38, %v139_v40 }
 0x18c   :  { %561 = vmatpush3.xpose.msk.msra.mxu1 %vm28_vm0, %v269_v32  ;;  %562 = vmatprep.mubr.msk.f32.mxu1 %vm644_vm3, %v643_v28  ;;  %v475_v0 = vmul.f32 %v388_v45, %v388_v45 }
 0x18d   :  { %v237_v43 = vsel %vm28_vm0, %v236_v42, 0.0  ;;  %565 = vmatprep.subr.mxu1 %v643_v28 }
 0x18e   :  { %238 = vadd.xlane.f32.xlu0 %v237_v43  ;;  %v476_v4 = vsel %vm28_vm0, %v475_v0, 0.0 }
 0x18f   :  { %563 = vmatmul.mubr.msk.f32.vlgmr.msra.gmra.mxu1 %vm28_vm0, %v269_v32 }
 0x190   :  { %567 = vmatprep.mubr.msk.f32.mxu1 %vm644_vm3, %v643_v28  ;;  %566 = vmatpush3.xpose.msk.msra.mxu1 %vm28_vm0, %v388_v45 }
 0x193   :  { %568 = vmatmul.mubr.msk.f32.vlgmr.msra.gmra.mxu1 %vm28_vm0, %v388_v45 }
 0x217   :  { %v239_v46 = vpop.xlane.xlu0 %238 }
 0x218   :  { %v240_v47 = vmul.f32 5.0, %v239_v46 }
 0x21a   :  { %v241_v48 = vmul.f32 1.442695, %v240_v47 }
 0x21c   :  { %609 = vpow2.f32 %v241_v48 }
 0x229   :  { %v610_v49 = vpop.eup %609 }
 0x22a   :  { %v244_v50 = vsel %vm243_vm4, %v610_v49, 0.0 }
 0x22b   :  { %245 = vadd.xlane.f32.xlu1 %v244_v50 }
 0x24b   :  { %v218_v52 = vpop.f32.mrf.mxu1 }
 0x24c   :  { %v222_v54 = vmul.f32 5.0, %v218_v52 }
 0x24d   :  { %v559_v55 = vpop.f32.mrf.mxu1 }
 0x24e   :  { %v223_v56 = vmul.f32 1.442695, %v222_v54 }
 0x24f   :  { %v339_v58 = vpop.f32.mrf.mxu1 }
 0x250   :  { %611 = vpow2.f32 %v223_v56  ;;  %v343_v59 = vmul.f32 5.0, %v339_v58 }
 0x251   :  { %v564_v60 = vpop.f32.mrf.mxu1  ;;  %613 = vpow2.f32 %v361_v57 }
 0x252   :  { %v344_v61 = vmul.f32 1.442695, %v343_v59 }
 0x253   :  { %v458_v3 = vpop.f32.mrf.mxu1 }
 0x254   :  { %615 = vpow2.f32 %v344_v61  ;;  %v462_v6 = vmul.f32 5.0, %v458_v3 }
 0x255   :  { %v569_v7 = vpop.f32.mrf.mxu1 }
 0x256   :  { %v463_v9 = vmul.f32 1.442695, %v462_v6 }
 0x258   :  { %617 = vpow2.f32 %v463_v9 }
 0x25d   :  { %v612_v62 = vpop.eup %611 }
 0x25e   :  { %v226_v63 = vsel %vm225_vm5, %v612_v62, 0.0  ;;  %v614_v1 = vpop.eup %613 }
 0x25f   :  { %227 = vadd.xlane.f32.xlu0 %v226_v63  ;;  %v363_v8 = vsel %vm243_vm4, %v614_v1, 0.0 }
 0x261   :  { %v616_v2 = vpop.eup %615 }
 0x262   :  { %v346_v5 = vsel %vm225_vm5, %v616_v2, 0.0 }
 0x263   :  { %477 = vadd.xlane.f32.xlu0 %v476_v4  ;;  %347 = vadd.xlane.f32.xlu1 %v346_v5 }
 0x265   :  { %v618_v10 = vpop.eup %617 }
 0x266   :  { %v465_v11 = vsel %vm225_vm5, %v618_v10, 0.0 }
 0x267   :  { %364 = vadd.xlane.f32.xlu0 %v363_v8  ;;  %466 = vadd.xlane.f32.xlu1 %v465_v11 }
 0x2b4   :  { %v246_v12 = vpop.xlane.xlu1 %245 }
 0x2b5   :  { %v247_v13 = vrot.slane %v246_v12, 4 }
 0x2b7   :  { %v248_v14 = vadd.f32 %v247_v13, %v246_v12 }
 0x2b9   :  { %v249_v15 = vrot.slane %v248_v14, 2 }
 0x2bb   :  { %v250_v20 = vadd.f32 %v249_v15, %v248_v14 }
 0x2bd   :  { %v251_v25 = vrot.slane %v250_v20, 1 }
 0x2bf   :  { %v252_v28 = vadd.f32 %v251_v25, %v250_v20 }
 0x2e8   :  { %v228_v16 = vpop.xlane.xlu0 %227 }
 0x2e9   :  { %v229_v17 = vrot.slane %v228_v16, 4 }
 0x2eb   :  { %v230_v18 = vadd.f32 %v229_v17, %v228_v16 }
 0x2ec   :  { %v478_v19 = vpop.xlane.xlu0 %477  ;;  %v348_v31 = vpop.xlane.xlu1 %347 }
 0x2ed   :  { %v231_v21 = vrot.slane %v230_v18, 2  ;;  %v479_v22 = vmul.f32 5.0, %v478_v19  ;;  %v349_v33 = vrot.slane %v348_v31, 4 }
 0x2ef   :  { %v480_v23 = vmul.f32 1.442695, %v479_v22  ;;  %v232_v24 = vadd.f32 %v231_v21, %v230_v18  ;;  %v350_v35 = vadd.f32 %v349_v33, %v348_v31 }
 0x2f0   :  { %v365_v32 = vpop.xlane.xlu0 %364  ;;  %v467_v51 = vpop.xlane.xlu1 %466 }
 0x2f1   :  { %619 = vpow2.f32 %v480_v23  ;;  %v233_v26 = vrot.slane %v232_v24, 1  ;;  %v366_v34 = vrot.slane %v365_v32, 4  ;;  %v351_v39 = vrot.slane %v350_v35, 2 }
 0x2f2   :  { %v468_v52 = vrot.slane %v467_v51, 4 }
 0x2f3   :  { %v234_v27 = vadd.f32 %v233_v26, %v232_v24  ;;  %v367_v38 = vadd.f32 %v366_v34, %v365_v32  ;;  %v352_v41 = vadd.f32 %v351_v39, %v350_v35 }
 0x2f4   :  { %v469_v53 = vadd.f32 %v468_v52, %v467_v51 }
 0x2f5   :  { %570 = vpush %v234_v27  ;;  %v368_v40 = vrot.slane %v367_v38, 2  ;;  %v353_v43 = vrot.slane %v352_v41, 1 }
 0x2f6   :  { %572 = vpush %v252_v28  ;;  %v470_v56 = vrot.slane %v469_v53, 2 }
 0x2f7   :  { %v369_v42 = vadd.f32 %v368_v40, %v367_v38  ;;  %v354_v48 = vadd.f32 %v353_v43, %v352_v41 }
 0x2f8   :  { %v471_v57 = vadd.f32 %v470_v56, %v469_v53 }
 0x2f9   :  { %v370_v45 = vrot.slane %v369_v42, 1 }
 0x2fa   :  { %v472_v58 = vrot.slane %v471_v57, 1 }
 0x2fb   :  { %v371_v50 = vadd.f32 %v370_v45, %v369_v42 }
 0x2fc   :  { %v473_v62 = vadd.f32 %v472_v58, %v471_v57 }
 0x2fe   :  { %v620_v29 = vpop.eup %619 }
 0x2ff   :  { %v482_v30 = vsel %vm243_vm4, %v620_v29, 0.0 }
 0x300   :  { %483 = vadd.xlane.f32.xlu0 %v482_v30 }
 0x326   :  { %s571_s0 = spop %570 }
 0x327   :  { %v254_v36 = vstv %s571_s0  ;;  %s573_s2 = spop %572 }
 0x328   :  { %621 = vlog2.f32 %v254_v36  ;;  %v258_v37 = vstv %s573_s2 }
 0x329   :  { %623 = vlog2.f32 %v258_v37 }
 0x335   :  { %v622_v44 = vpop.eup %621 }
 0x336   :  { %v624_v46 = vpop.eup %623  ;;  %v256_v47 = vmul.f32 0.6931472, %v622_v44 }
 0x337   :  { %v260_v49 = vmul.f32 0.6931472, %v624_v46 }
 0x338   :  { %574 = vpush %v256_v47 }
 0x339   :  { %576 = vpush %v260_v49 }
 0x33a   :  { %578 = vpush %v354_v48 }
 0x33b   :  { %580 = vpush %v371_v50 }
 0x369   :  { %s725_s25 = spop %574 }
 0x36a   :  { %s727_s26 = spop %576 }
 0x36b   :  { %s262_s27 = ssub.f32 %s725_s25, %s727_s26  ;;  %s579_s28 = spop %578 }
 0x36c   :  { %v373_v54 = vstv %s579_s28  ;;  %s581_s29 = spop %580 }
 0x36d   :  { %625 = vlog2.f32 %v373_v54  ;;  %v377_v55 = vstv %s581_s29  ;;  %s263_s4 = smul.f32 2.0, %s262_s27 }
 0x36e   :  { %627 = vlog2.f32 %v377_v55 }
 0x37a   :  { %v626_v59 = vpop.eup %625 }
 0x37b   :  { %v628_v60 = vpop.eup %627  ;;  %v375_v61 = vmul.f32 0.6931472, %v626_v59 }
 0x37c   :  { %v379_v63 = vmul.f32 0.6931472, %v628_v60 }
 0x37d   :  { %582 = vpush %v375_v61 }
 0x37e   :  { %584 = vpush %v379_v63 }
 0x37f   :  { %586 = vpush %v473_v62 }
 0x389   :  { %v484_v0 = vpop.xlane.xlu0 %483 }
 0x38a   :  { %v485_v1 = vrot.slane %v484_v0, 4 }
 0x38c   :  { %v486_v2 = vadd.f32 %v485_v1, %v484_v0 }
 0x38e   :  { %v487_v3 = vrot.slane %v486_v2, 2 }
 0x390   :  { %v488_v4 = vadd.f32 %v487_v3, %v486_v2 }
 0x392   :  { %v489_v5 = vrot.slane %v488_v4, 1 }
 0x394   :  { %v490_v6 = vadd.f32 %v489_v5, %v488_v4 }
 0x396   :  { %588 = vpush %v490_v6 }
 0x3ae   :  { %s583_s30 = spop %582 }
 0x3af   :  { %s585_s5 = spop %584 }
 0x3b0   :  { %s381_s6 = ssub.f32 %s583_s30, %s585_s5  ;;  %s587_s7 = spop %586 }
 0x3b1   :  { %v492_v7 = vstv %s587_s7 }
 0x3b2   :  { %s382_s8 = sadd.f32 %s381_s6, %s263_s4  ;;  %629 = vlog2.f32 %v492_v7 }
 0x3bf   :  { %v630_v8 = vpop.eup %629 }
 0x3c0   :  { %v494_v9 = vmul.f32 0.6931472, %v630_v8 }
 0x3c2   :  { %590 = vpush %v494_v9 }
 0x3c7   :  { %s589_s9 = spop %588 }
 0x3c8   :  { %v496_v10 = vstv %s589_s9 }
 0x3c9   :  { %631 = vlog2.f32 %v496_v10 }
 0x3d6   :  { %v632_v11 = vpop.eup %631 }
 0x3d7   :  { %v498_v12 = vmul.f32 0.6931472, %v632_v11 }
 0x3d9   :  { %592 = vpush %v498_v12 }
 0x3f3   :  { %s591_s10 = spop %590 }
 0x40a   :  { %s593_s11 = spop %592 }
 0x40b   :  { %s500_s12 = ssub.f32 %s591_s10, %s593_s11 }
 0x40d   :  { %s501_s13 = sadd.f32 %s500_s12, %s382_s8 }
 0x40f   :  { %503 = sst [smem:[#allocation2]] %s501_s13 }
 0x410   :  { %511 = dma.smem_to_hbm %s645_s14, 16, %s737_s3, [#allocation3]  }
 0x411   :  { %641 = dma.done.wait [#allocation3], 16  }
 0x412   :  { %642 = vsyncadd [#allocation3], 4294967280 }
 0x413   :  { %515 = sfence }
 0x414   :  { %516 = vsyncpa [#allocation3], 1 }

</bundles_post_ra>
